<compile_context>
chip_gen: v7x
topology: tpu7x:2x2x1
jax: 0.10.0
libtpu: 0.0.40
codegen_flags: <defaults>
</compile_context>

<pallas_src>
import functools

import jax
import jax.numpy as jnp
from jax.experimental import pallas as pl
from jax.experimental.pallas import tpu as pltpu


def _dyrelu_apply_kernel(coefs_ref, x_ref, o_ref, *, k):
    """out = max_j(x * a_j + c_j) over one (TB, TS) tile.

    coefs_ref: (TB, 2k) float32 VMEM block (per-batch coefficients, rows
               aligned with the batch rows of this tile).
    x_ref / o_ref: (TB, TS) VMEM tiles of the flattened activation.
    """
    x = x_ref[...].astype(jnp.float32)          # f32 math; cast only the result
    a = coefs_ref[...]                          # (TB, 2k) f32

    # (TB, 1) column -> lane broadcast over TS (standard VPU pattern).
    out = x * a[:, 0:1] + a[:, k:k + 1]
    for j in range(1, k):                       # k is small and static
        out = jnp.maximum(out, x * a[:, j:j + 1] + a[:, k + j:k + j + 1])

    o_ref[...] = out.astype(o_ref.dtype)


def _coefs(x, w1, b1, w2, b2, lambdas, init_v):
    """Hoisted squeeze-excite MLP: (B, C, H, W) -> (B, 2k) float32 coefs."""
    xf = x.astype(jnp.float32)
    theta = jnp.mean(jnp.mean(xf, axis=-1), axis=-1)              # (B, C)
    theta = jnp.maximum(theta @ w1.T + b1, 0.0)                   # (B, Cr)
    theta = theta @ w2.T + b2                                     # (B, 2k)
    theta = 2.0 * jax.nn.sigmoid(theta) - 1.0
    return (theta * lambdas + init_v).astype(jnp.float32)         # (B, 2k)


def _choose_tiles(B, S, itemsize, target_bytes=2 * 1024 * 1024):
    """Pick (TB, TS) block dims for the flattened (B, S) activation.

    Constraints ((8,128) tiling rule):
      * TS is a multiple of 128, or equals S (full row).
      * TB is a multiple of the sublane packing (8 f32, 16 bf16, 32 int8),
        or equals B.
    Goal: TB*TS*itemsize ~ 2 MiB (byte-budget tiling), prefer TS that divides S
    (unmasked lane-dense stores), fold batches together when S is small or not
    a multiple of 128, and keep >= ~8 grid programs when there is enough work.
    """
    sub = max(8, 32 // itemsize)                 # sublane packing granularity
    total = B * S

    target = max(target_bytes // itemsize, sub * 128)          # elems per tile
    # Keep several grid programs for large problems (v7x dual-TC, pipeline),
    # but let tiny problems collapse to a single full block.
    target = max(min(target, max(total // 8, 64 * 1024)), sub * 128)

    tb_min = B if B < sub else sub
    row_budget = max(target // tb_min, 128)

    if S <= row_budget:
        # Whole rows fit in the budget: take the full feature map per row and
        # stack batch rows to fill the tile (handles small / non-%128 S).
        ts = S
        tb = max(tb_min, target // max(S, 1))
        if tb >= B:
            tb = B
        else:
            tb = max((tb // sub) * sub, tb_min)
    else:
        tb = tb_min
        cap = max((row_budget // 128) * 128, 128)
        ts = 0
        d = cap
        while d >= 128:                          # prefer a divisor of S
            if S % d == 0:
                ts = d
                break
            d -= 128
        if ts == 0:
            ts = cap                             # last lane-tile masked (rare)
    return tb, ts


def dynamic_relu_a(x_nchw, w1, b1, w2, b2, lambdas, init_v):
    """Pallas implementation of DynamicReLUA.forward (conv_type='2d')."""
    B, C, H, W = x_nchw.shape
    k = w2.shape[0] // 2

    # Tiny per-batch coefficients, computed outside the streaming kernel.
    coefs = _coefs(x_nchw, w1, b1, w2, b2, lambdas, init_v)       # (B, 2k) f32

    # Lane-dense flattening (layout plumbing in the wrapper, not compute).
    S = C * H * W
    x2 = x_nchw.reshape(B, S)

    itemsize = jnp.dtype(x_nchw.dtype).itemsize
    TB, TS = _choose_tiles(B, S, itemsize)
    grid = (pl.cdiv(B, TB), pl.cdiv(S, TS))

    out = pl.pallas_call(
        functools.partial(_dyrelu_apply_kernel, k=k),
        out_shape=jax.ShapeDtypeStruct((B, S), x_nchw.dtype),
        grid=grid,
        in_specs=[
            # Per-batch coefficients: tiny VMEM block, re-used across the S axis.
            pl.BlockSpec((TB, 2 * k), lambda bi, si: (bi, 0)),
            # Activation tile.
            pl.BlockSpec((TB, TS), lambda bi, si: (bi, si)),
        ],
        out_specs=pl.BlockSpec((TB, TS), lambda bi, si: (bi, si)),
        compiler_params=pltpu.CompilerParams(
            dimension_semantics=("parallel", "parallel"),
            # Explicit: ~2 MiB tiles x (2 in + 2 out) buffers + f32 temporaries
            # fits comfortably; don't rely on v5e's 16 MiB scoped default.
            vmem_limit_bytes=32 * 1024 * 1024,
        ),
    )(coefs, x2)

    return out.reshape(B, C, H, W)


def dynamic_relu_a_reference(x, w1, b1, w2, b2, lambdas, init_v):
    """Pure-JAX reference mirroring the PyTorch module."""
    k = w2.shape[0] // 2
    theta = jnp.mean(x, axis=-1)                    # mean over W
    theta = jnp.mean(theta, axis=-1)                # mean over H -> (B, C)
    theta = theta @ w1.T + b1
    theta = jnp.maximum(theta, 0.0)
    theta = theta @ w2.T + b2
    theta = 2.0 * jax.nn.sigmoid(theta) - 1.0
    coefs = theta * lambdas + init_v                # (B, 2k)
    a = coefs[:, :k]
    c = coefs[:, k:]
    y = (x[..., None] * a[:, None, None, None, :]
         + c[:, None, None, None, :])               # (B, C, H, W, k)
    return jnp.max(y, axis=-1)


if __name__ == "__main__":
    # Small, deterministic problem: B=2, C=8, H=W=16, reduction=4, k=2.
    B, C, H, W = 2, 8, 16, 16
    reduction, k = 4, 2
    Cr = C // reduction

    key = jax.random.PRNGKey(0)
    k1, k2, k3, k4, kx = jax.random.split(key, 5)

    w1 = jax.random.normal(k1, (Cr, C), jnp.float32) / jnp.sqrt(C)
    b1 = jax.random.normal(k2, (Cr,), jnp.float32) * 0.1
    w2 = jax.random.normal(k3, (2 * k, Cr), jnp.float32) / jnp.sqrt(Cr)
    b2 = jax.random.normal(k4, (2 * k,), jnp.float32) * 0.1

    lambdas = jnp.array([1.0] * k + [0.5] * k, jnp.float32)
    init_v = jnp.array([1.0] + [0.0] * (2 * k - 1), jnp.float32)

    x = jax.random.normal(kx, (B, C, H, W), jnp.float32)

    out = jax.block_until_ready(
        dynamic_relu_a(x, w1, b1, w2, b2, lambdas, init_v))

    ref = dynamic_relu_a_reference(x, w1, b1, w2, b2, lambdas, init_v)
    assert out.shape == (B, C, H, W)
    assert jnp.allclose(out, ref, rtol=1e-5, atol=1e-5), "mismatch vs reference"

    print("KERNEL_OK")
</pallas_src>

<mosaic_0001>
module attributes {stable_mosaic.version = 11 : i64} {
  func.func @_dyrelu_apply_kernel(%arg0: i32, %arg1: i32, %arg2: memref<2x4xf32, #tpu.memory_space<vmem>>, %arg3: memref<2x2048xf32, #tpu.memory_space<vmem>>, %arg4: memref<2x2048xf32, #tpu.memory_space<vmem>>) attributes {dimension_semantics = [#tpu.dimension_semantics<parallel>, #tpu.dimension_semantics<parallel>], iteration_bounds = array<i64: 1, 1>, scalar_prefetch = 0 : i64, scratch_operands = 0 : i64, tpu.core_type = #tpu.core_type<tc>, window_params = [{transform_indices = @transform_0, window_bounds = array<i64: 2, 4>}, {transform_indices = @transform_1, window_bounds = array<i64: 2, 2048>}, {transform_indices = @transform_2, window_bounds = array<i64: 2, 2048>}]} {
    %c0 = arith.constant 0 : index
    %c0_0 = arith.constant 0 : index
    %0 = vector.load %arg3[%c0, %c0_0] : memref<2x2048xf32, #tpu.memory_space<vmem>>, vector<2x2048xf32>
    %c0_1 = arith.constant 0 : index
    %c0_2 = arith.constant 0 : index
    %1 = vector.load %arg2[%c0_1, %c0_2] : memref<2x4xf32, #tpu.memory_space<vmem>>, vector<2x4xf32>
    %2 = vector.extract_strided_slice %1 {offsets = [0, 0], sizes = [2, 1], strides = [1, 1]} : vector<2x4xf32> to vector<2x1xf32>
    %3 = vector.broadcast %2 : vector<2x1xf32> to vector<2x2048xf32>
    %4 = arith.mulf %0, %3 : vector<2x2048xf32>
    %5 = vector.extract_strided_slice %1 {offsets = [0, 2], sizes = [2, 1], strides = [1, 1]} : vector<2x4xf32> to vector<2x1xf32>
    %6 = vector.broadcast %5 : vector<2x1xf32> to vector<2x2048xf32>
    %7 = arith.addf %4, %6 : vector<2x2048xf32>
    %8 = vector.extract_strided_slice %1 {offsets = [0, 1], sizes = [2, 1], strides = [1, 1]} : vector<2x4xf32> to vector<2x1xf32>
    %9 = vector.broadcast %8 : vector<2x1xf32> to vector<2x2048xf32>
    %10 = arith.mulf %0, %9 : vector<2x2048xf32>
    %11 = vector.extract_strided_slice %1 {offsets = [0, 3], sizes = [2, 1], strides = [1, 1]} : vector<2x4xf32> to vector<2x1xf32>
    %12 = vector.broadcast %11 : vector<2x1xf32> to vector<2x2048xf32>
    %13 = arith.addf %10, %12 : vector<2x2048xf32>
    %14 = arith.maximumf %7, %13 : vector<2x2048xf32>
    %c0_3 = arith.constant 0 : index
    %c0_4 = arith.constant 0 : index
    %15 = vector.load %arg4[%c0_3, %c0_4] : memref<2x2048xf32, #tpu.memory_space<vmem>>, vector<2x2048xf32>
    tpu.vector_store %arg4[%c0_3, %c0_4], %14 {strides = array<i32>} : memref<2x2048xf32, #tpu.memory_space<vmem>>, vector<2x2048xf32>,
    return
  }
  func.func @transform_0(%arg0: i32, %arg1: i32) -> (i32, i32) {
    %c0_i32 = arith.constant 0 : i32
    %c0_i32_0 = arith.constant 0 : i32
    return %arg0, %c0_i32 : i32, i32
  }
  func.func @transform_1(%arg0: i32, %arg1: i32) -> (i32, i32) {
    %c0_i32 = arith.constant 0 : i32
    return %arg0, %arg1 : i32, i32
  }
  func.func @transform_2(%arg0: i32, %arg1: i32) -> (i32, i32) {
    %c0_i32 = arith.constant 0 : i32
    return %arg0, %arg1 : i32, i32
  }
}

</mosaic_0001>

<bundles_post_ra>
// kernel: tpu_custom_call.1
= control target key start
LH: loop header
LB: loop body
LE: loop exit
PB: predicated region body
PF: predicated region fallthrough
CT: control target
= control target key end

     0   :  { %7 = vsyncpa [#allocation3], 0  ;;  %s270_s0 = inlined_call_operand.hbm [shape: f32[2,4], index: 0, kind: input, shape index: {}]   ;;  %s271_s1 = inlined_call_operand.hbm [shape: f32[2,2048], index: 1, kind: input, shape index: {}]   ;;  %s272_s2 = inlined_call_operand.hbm [shape: f32[2,2048], index: 2, kind: output, shape index: {}]  }
   0x1   :  { %8 = vsyncpa [#allocation6], 0 }
   0x2   :  { %9 = vsyncpa [#allocation4], 0  ;;  %s211_s9 = smov [#allocation2]   ;;  %s212_s11 = smov [#allocation5]  }
   0x3   :  { %s16_s10 = sshll.u32 %s211_s9, 4  ;;  %s26_s12 = sshll.u32 %s212_s11, 4  ;;  %s17_s10 = int_to_ptr.vmem [resolvable:$true] %s16_s10  ;;  %s27_s12 = int_to_ptr.vmem [resolvable:$true] %s26_s12 }
   0x4   :  { %s139_s15 = scalar_lea.hbm %s270_s0, 32 }
   0x5   :  { %p140_p0 = scmp.ne.s32.totalorder %s270_s0, %s139_s15  ;;  %p143_p1 = scmp.lt.u32.totalorder %s139_s15, %s270_s0 }
   0x7   :  { %p145_p2 = pnand %p143_p1, %p140_p0 }
   0x9   :  { %148 = shalt.err (!%p145_p2)
}
   0xa   :  { %s149_s20 = scalar_lea.vmem %s17_s10, 32  ;;  %p154_p4 = scmp.lt.s32.totalorder %s17_s10, %s17_s10 }
   0xb   :  { %p150_p3 = scmp.ne.s32.totalorder %s17_s10, %s149_s20  ;;  %p155_p5 = scmp.lt.s32.totalorder %s149_s20, %s149_s20 }
   0xd   :  { %p156_p6 = por %p155_p5, %p154_p4 }
   0xf   :  { %p157_p7 = pnand %p156_p6, %p150_p3 }
  0x11   :  { %160 = shalt.err (!%p157_p7)
}
  0x12   :  { %19 = dma.hbm_to_vmem [thread:$0]  %s270_s0, 32, %s17_s10, [#allocation3]  }
  0x13   :  { %s161_s25 = scalar_lea.hbm %s271_s1, 512 }
  0x14   :  { %p162_p8 = scmp.ne.s32.totalorder %s271_s1, %s161_s25  ;;  %p165_p9 = scmp.lt.u32.totalorder %s161_s25, %s271_s1 }
  0x16   :  { %p167_p10 = pnand %p165_p9, %p162_p8 }
  0x18   :  { %170 = shalt.err (!%p167_p10)
}
  0x19   :  { %s171_s30 = scalar_lea.vmem %s27_s12, 512  ;;  %p176_p12 = scmp.lt.s32.totalorder %s27_s12, %s27_s12 }
  0x1a   :  { %p172_p11 = scmp.ne.s32.totalorder %s27_s12, %s171_s30  ;;  %p177_p13 = scmp.lt.s32.totalorder %s171_s30, %s171_s30 }
  0x1c   :  { %p178_p0 = por %p177_p13, %p176_p12 }
  0x1e   :  { %p179_p1 = pnand %p178_p0, %p172_p11 }
  0x20   :  { %182 = shalt.err (!%p179_p1)
}
  0x21   :  { %29 = dma.hbm_to_vmem [thread:$0]  %s271_s1, 512, %s27_s12, [#allocation6]  }
  0x22   :  { %205 = dma.done.wait [#allocation3], 32  }
  0x23   :  { %206 = vsyncadd [#allocation3], 4294967264 }
  0x24   :  { %207 = dma.done.wait [#allocation6], 512  }
  0x25   :  { %208 = vsyncadd [#allocation6], 4294966784  ;;  %v213_v0 = vmov 0   ;;  %v214_v1 = vmov 2   ;;  %v40_v2 = vld [vmem:[#allocation2] sm:$0x3]  ;;  %v48_v7 = vlaneseq }
  0x26   :  { %134 = vset.pattern.permute.xlu0 %v213_v0  ;;  %136 = vset.pattern.permute.xlu1 %v214_v1  ;;  %v215_v3 = vmov 1   ;;  %v216_v4 = vmov 3   ;;  %v217_v5 = vmov 269488144   ;;  %v36_v13 = vld [vmem:[#allocation5] sm:$0xff]  ;;  %v37_v15 = vld [vmem:[#allocation5 + $0x8] sm:$0xff] }
  0x27   :  { %43 = vperm.xlu0 %134, %v40_v2   ;;  %58 = vperm.xlu1 %136, %v40_v2   ;;  %v46_v6 = vunpack.c.l.s4 %v217_v5  ;;  %v49_v9 = vshrl.u32 %v48_v7, 7  ;;  %v38_v16 = vld [vmem:[#allocation5 + $0x10] sm:$0xff]  ;;  %v39_v17 = vld [vmem:[#allocation5 + $0x18] sm:$0xff]  ;;  %s218_s1 = smov [#allocation7]  }
  0x28   :  { %s116_s4 = sshll.u32 %s218_s1, 4  ;;  %s117_s4 = int_to_ptr.vmem [resolvable:$true] %s116_s4 }
  0x29   :  { %v47_v8 = vunpack.c.0.s8 %v46_v6  ;;  %s183_s5 = scalar_lea.vmem %s117_s4, 512  ;;  %p188_p3 = scmp.lt.s32.totalorder %s117_s4, %s117_s4 }
  0x2a   :  { %p184_p2 = scmp.ne.s32.totalorder %s117_s4, %s183_s5  ;;  %p189_p4 = scmp.lt.s32.totalorder %s183_s5, %s183_s5 }
  0x2b   :  { %135 = vset.pattern.permute.xlu0 %v215_v3  ;;  %137 = vset.pattern.permute.xlu1 %v216_v4  ;;  %v50_v10 = vsub.s32 %v47_v8, %v49_v9 }
  0x2c   :  { %73 = vperm.xlu0 %135, %v40_v2   ;;  %88 = vperm.xlu1 %137, %v40_v2   ;;  %p190_p5 = por %p189_p4, %p188_p3 }
  0x2e   :  { %p191_p6 = pnand %p190_p5, %p184_p2 }
  0x30   :  { %138 = vset.pattern.permute.xlu0 %v216_v4 }
  0xa6   :  { %v44_v11 = vpop.permute.xlu0 %43  ;;  %v59_v12 = vpop.permute.xlu1 %58 }
  0xa7   :  { %v51_v14 = vrot.slane %v44_v11, %v50_v10  ;;  %v66_v18 = vrot.slane %v59_v12, %v50_v10 }
  0xa9   :  { %v53_v19 = vmul.f32 %v51_v14, %v36_v13  ;;  %v54_v20 = vmul.f32 %v51_v14, %v37_v15  ;;  %v55_v21 = vmul.f32 %v51_v14, %v38_v16  ;;  %v56_v22 = vmul.f32 %v51_v14, %v39_v17 }
  0xab   :  { %v74_v23 = vpop.permute.xlu0 %73  ;;  %v89_v24 = vpop.permute.xlu1 %88  ;;  %v68_v31 = vadd.f32 %v66_v18, %v53_v19  ;;  %v69_v32 = vadd.f32 %v66_v18, %v54_v20  ;;  %v70_v33 = vadd.f32 %v66_v18, %v55_v21  ;;  %v71_v34 = vadd.f32 %v66_v18, %v56_v22 }
  0xac   :  { %v81_v25 = vrot.slane %v74_v23, %v50_v10  ;;  %v96_v26 = vrot.slane %v89_v24, %v50_v10 }
  0xae   :  { %v83_v27 = vmul.f32 %v81_v25, %v36_v13  ;;  %v84_v28 = vmul.f32 %v81_v25, %v37_v15  ;;  %v85_v29 = vmul.f32 %v81_v25, %v38_v16  ;;  %v86_v30 = vmul.f32 %v81_v25, %v39_v17 }
  0xb0   :  { %v98_v35 = vadd.f32 %v96_v26, %v83_v27  ;;  %v99_v36 = vadd.f32 %v96_v26, %v84_v28  ;;  %v100_v37 = vadd.f32 %v96_v26, %v85_v29  ;;  %v101_v38 = vadd.f32 %v96_v26, %v86_v30 }
  0xb2   :  { %v102_v39 = vmax.f32 %v68_v31, %v98_v35  ;;  %v103_v40 = vmax.f32 %v69_v32, %v99_v36  ;;  %v104_v41 = vmax.f32 %v70_v33, %v100_v37  ;;  %v105_v42 = vmax.f32 %v71_v34, %v101_v38 }
  0xb4   :  { %106 = vst [vmem:[#allocation7] sm:$0xff] %v102_v39  ;;  %107 = vst [vmem:[#allocation7 + $0x8] sm:$0xff] %v103_v40 }
  0xb5   :  { %108 = vst [vmem:[#allocation7 + $0x10] sm:$0xff] %v104_v41  ;;  %109 = vst [vmem:[#allocation7 + $0x18] sm:$0xff] %v105_v42 }
  0xb6   :  { %194 = shalt.err (!%p191_p6)
}
  0xb7   :  { %s195_s8 = scalar_lea.hbm %s272_s2, 512 }
  0xb8   :  { %p196_p7 = scmp.ne.s32.totalorder %s272_s2, %s195_s8  ;;  %p199_p8 = scmp.lt.u32.totalorder %s195_s8, %s272_s2 }
  0xba   :  { %p201_p9 = pnand %p199_p8, %p196_p7 }
  0xbc   :  { %204 = shalt.err (!%p201_p9)
}
  0xbd   :  { %119 = dma.vmem_to_hbm [thread:$0]  %s117_s4, 512, %s272_s2, [#allocation4]  }
  0xbe   :  { %209 = dma.done.wait [#allocation4], 512  }
  0xbf   :  { %210 = vsyncadd [#allocation4], 4294966784 }
  0xc0   :  { %123 = vsyncpa [#allocation3], 1 }
  0xc1   :  { %124 = vsyncpa [#allocation6], 1 }
  0xc2   :  { %125 = vsyncpa [#allocation4], 1 }

</bundles_post_ra>
